<compile_context>
chip_gen: v5e
topology: v5e:2x2
jax: 0.10.0
libtpu: 0.0.40
codegen_flags: <defaults>
</compile_context>

<pallas_src>
import functools

import jax
import jax.numpy as jnp
from jax.experimental import pallas as pl
from jax.experimental.pallas import tpu as pltpu


def _round_up(x, m):
    return (x + m - 1) // m * m


def _cdiv(a, b):
    return (a + b - 1) // b


def _vmem_capacity_bytes():
    """Per-TensorCore VMEM capacity; conservative fallback if the query fails."""
    try:
        info = pltpu.get_tpu_info()
        cap = int(getattr(info, "vmem_capacity_bytes", 0) or 0)
        if cap > 0:
            return cap
    except Exception:
        pass
    return 64 * 1024 * 1024  # v7x per-TC VMEM; safe lower bound for v5e/v6e too


def _choose_tile_rows(n, c, r, pred_itemsize, true_itemsize, budget_bytes):
    """Rows (of 128 lanes) per spatial tile.

    Sized for `budget_bytes` of VMEM: double-buffered input blocks plus ~5 f32
    (N, TR, 128) working slabs for the channel-unrolled softmax.  Clamped so
    that (a) the grid has >= 4 steps when R is large enough (lets both v7x
    TensorCores run and hides the prefetch DMA) and (b) each per-(n, c)
    contiguous DMA run stays >= 16*128 elements (>= 8 KiB at f32) for v5e.
    """
    per_row = (2 * n * (c * pred_itemsize + true_itemsize) * 128  # 2x pipelined inputs
               + 5 * n * 128 * 4)                                 # f32 working set
    max_tr = max(8, (budget_bytes // per_row) // 8 * 8)
    max_tr = min(max_tr, 1024)
    if r >= 4 * 16:
        tr_4 = _round_up(_cdiv(r, 4), 8)        # aim for >= 4 grid steps ...
        max_tr = min(max_tr, max(tr_4, 16))     # ... but keep DMA runs >= 8 KiB
    if max_tr >= r:
        return r                                # full extent (no multiple-of-8 need)
    return max_tr


def _dice_partials_kernel(pred_ref, true_ref, out_ref, *, s_total, mask_needed):
    """Per-tile partial sums for the dice loss.

    pred_ref: (N, C, TR, 128) logits tile (native dtype)
    true_ref: (N, 1, TR, 128) channel-1 target tile (native dtype)
    out_ref : (1, 8, 128) f32; sublane 0 = intersection, 1 = pred_sum, 2 = true_sum
    """
    n, c, tr, _ = pred_ref.shape

    x1 = pred_ref[:, 1].astype(jnp.float32)                  # (N, TR, 128)
    if c == 2:
        # softmax(x, axis=1)[:, 1] == sigmoid(x1 - x0): one exp + one exact recip.
        x0 = pred_ref[:, 0].astype(jnp.float32)
        p1 = pl.reciprocal(1.0 + jnp.exp(x0 - x1), approx=False)
    else:
        # Channel-unrolled two-pass softmax: only (N, TR, 128) f32 temporaries,
        # all reductions over C are elementwise VPU ops (no XLU axis reduce).
        m = x1
        for ch in range(c):
            if ch != 1:
                m = jnp.maximum(m, pred_ref[:, ch].astype(jnp.float32))
        e1 = jnp.exp(x1 - m)
        denom = e1
        for ch in range(c):
            if ch != 1:
                denom = denom + jnp.exp(pred_ref[:, ch].astype(jnp.float32) - m)
        p1 = e1 * pl.reciprocal(denom, approx=False)

    t1 = true_ref[:, 0].astype(jnp.float32)                  # (N, TR, 128)

    if mask_needed:
        # Last tile reads out of bounds (and/or lane padding when H*W % 128 != 0):
        # mask BOTH operands so garbage (possibly NaN/Inf) never reaches a sum.
        row = jax.lax.broadcasted_iota(jnp.int32, (1, tr, 128), 1)
        lane = jax.lax.broadcasted_iota(jnp.int32, (1, tr, 128), 2)
        elem = (pl.program_id(0) * tr + row) * 128 + lane
        valid = elem < s_total
        p1 = jnp.where(valid, p1, 0.0)
        t1 = jnp.where(valid, t1, 0.0)

    inter = jnp.sum(p1 * t1)
    psum = jnp.sum(p1)
    tsum = jnp.sum(t1)

    sub = jax.lax.broadcasted_iota(jnp.int32, (1, 8, 128), 1)
    out_ref[...] = jnp.where(
        sub == 0, inter,
        jnp.where(sub == 1, psum,
                  jnp.where(sub == 2, tsum, 0.0)))


def dice_loss(y_pred, y_true, smooth=1e-05, *, tile_rows=None):
    """Pallas TPU implementation of DiceLoss.forward.

    y_pred, y_true: (N, C, H, W) arrays (NCHW, matching the PyTorch module).
    Returns a scalar float32 loss.
    """
    n, c, h, w = y_pred.shape
    assert y_true.shape == y_pred.shape
    assert c >= 2, "DiceLoss selects softmax channel 1; need C >= 2"
    s = h * w
    r = _cdiv(s, 128)

    p = y_pred.reshape(n, c, s)
    if s % 128 == 0:
        # Common case: both reshapes are free views; only channel 1 of y_true is
        # ever DMA'd (the BlockSpec slices it straight out of HBM).
        t = y_true.reshape(n, c, s)
        true_ch_block = 1
    else:
        # Rare case (H*W not a multiple of 128): pad the lane dim so the 4-D view
        # below is valid.  y_true is sliced to channel 1 first so its copy stays
        # small; the padded tail is masked out in-kernel.
        pad = r * 128 - s
        p = jnp.pad(p, ((0, 0), (0, 0), (0, pad)))
        t = jnp.pad(y_true[:, 1:2].reshape(n, 1, s), ((0, 0), (0, 0), (0, pad)))
        true_ch_block = 0
    p = p.reshape(n, c, r, 128)
    t = t.reshape(n, t.shape[1], r, 128)

    vmem_cap = _vmem_capacity_bytes()
    data_budget = (vmem_cap * 3) // 8            # ~24 MiB on v7x, ~48 MiB on v5e/v6e

    if tile_rows is None:
        tr = _choose_tile_rows(n, c, r, p.dtype.itemsize, t.dtype.itemsize,
                               data_budget)
    else:
        tr = int(tile_rows)
        if tr < r:
            tr = max(8, _round_up(tr, 8))
        tr = min(tr, r)
    num_tiles = _cdiv(r, tr)
    mask_needed = (num_tiles * tr * 128 != s)

    block_bytes = (n * c * tr * 128 * p.dtype.itemsize
                   + n * tr * 128 * t.dtype.itemsize
                   + 5 * n * tr * 128 * 4)
    vmem_limit = int(min((vmem_cap * 5) // 8,    # <=40 MiB on v7x, <=80 MiB v5e/v6e
                         max(16 * 1024 * 1024, 3 * block_bytes)))

    cost = pl.CostEstimate(
        flops=int(n * s * (3 * c + 5)),
        transcendentals=int(n * s * (1 if c == 2 else c)),
        bytes_accessed=int(p.size * p.dtype.itemsize
                           + n * r * 128 * t.dtype.itemsize
                           + num_tiles * 8 * 128 * 4),
    )

    partials = pl.pallas_call(
        functools.partial(_dice_partials_kernel, s_total=s,
                          mask_needed=mask_needed),
        out_shape=jax.ShapeDtypeStruct((num_tiles, 8, 128), jnp.float32),
        grid=(num_tiles,),
        in_specs=[
            pl.BlockSpec((n, c, tr, 128), lambda i: (0, 0, i, 0)),
            pl.BlockSpec((n, 1, tr, 128),
                         lambda i, _cb=true_ch_block: (0, _cb, i, 0)),
        ],
        out_specs=pl.BlockSpec((1, 8, 128), lambda i: (i, 0, 0)),
        compiler_params=pltpu.CompilerParams(
            dimension_semantics=("parallel",),
            vmem_limit_bytes=vmem_limit,
        ),
        cost_estimate=cost,
    )(p, t)

    intersection = jnp.sum(partials[:, 0, 0])
    pred_sum = jnp.sum(partials[:, 1, 0])
    true_sum = jnp.sum(partials[:, 2, 0])
    dice = (2.0 * intersection + smooth) / (pred_sum + true_sum + smooth)
    return (1.0 - dice).astype(jnp.float32)


def _dice_loss_ref(y_pred, y_true, smooth=1e-05):
    # pure-JAX reference mirroring the PyTorch module
    p = jax.nn.softmax(y_pred.astype(jnp.float32), axis=1)[:, 1].reshape(-1)
    t = y_true[:, 1].astype(jnp.float32).reshape(-1)
    intersection = jnp.sum(p * t)
    dice = (2.0 * intersection + smooth) / (jnp.sum(p) + jnp.sum(t) + smooth)
    return 1.0 - dice


if __name__ == "__main__":
    key = jax.random.PRNGKey(0)
    k1, k2, k3, k4, k5, k6 = jax.random.split(key, 6)

    # Case 1: C=4, S=256 (multiple of 128) -> no pad, general softmax path.
    N, C, H, W = 2, 4, 16, 16
    y_pred = jax.random.normal(k1, (N, C, H, W), dtype=jnp.float32)
    labels = jax.random.randint(k2, (N, H, W), 0, C)
    y_true = jax.nn.one_hot(labels, C, axis=1, dtype=jnp.float32)

    loss = jax.block_until_ready(dice_loss(y_pred, y_true))
    ref = jax.block_until_ready(_dice_loss_ref(y_pred, y_true))
    assert jnp.isfinite(loss), "non-finite loss"
    assert jnp.allclose(loss, ref, atol=1e-5, rtol=1e-5), (loss, ref)

    # Case 2: binary segmentation (C=2) -> exercises the sigmoid specialization.
    C2 = 2
    y_pred2 = jax.random.normal(k3, (N, C2, H, W), dtype=jnp.float32)
    labels2 = jax.random.randint(k4, (N, H, W), 0, C2)
    y_true2 = jax.nn.one_hot(labels2, C2, axis=1, dtype=jnp.float32)

    loss2 = jax.block_until_ready(dice_loss(y_pred2, y_true2))
    ref2 = jax.block_until_ready(_dice_loss_ref(y_pred2, y_true2))
    assert jnp.isfinite(loss2), "non-finite loss (binary case)"
    assert jnp.allclose(loss2, ref2, atol=1e-5, rtol=1e-5), (loss2, ref2)

    # Case 3: H*W = 1600 (not a multiple of 128) with tile_rows=8 -> 2 grid steps,
    # last block reads out of bounds + lane padding -> exercises the in-kernel mask.
    H3, W3 = 40, 40
    y_pred3 = jax.random.normal(k5, (N, C, H3, W3), dtype=jnp.float32)
    labels3 = jax.random.randint(k6, (N, H3, W3), 0, C)
    y_true3 = jax.nn.one_hot(labels3, C, axis=1, dtype=jnp.float32)

    loss3 = jax.block_until_ready(dice_loss(y_pred3, y_true3, tile_rows=8))
    ref3 = jax.block_until_ready(_dice_loss_ref(y_pred3, y_true3))
    assert jnp.isfinite(loss3), "non-finite loss (ragged case)"
    assert jnp.allclose(loss3, ref3, atol=1e-5, rtol=1e-5), (loss3, ref3)

    print("KERNEL_OK")
</pallas_src>

<mosaic_0001>
module attributes {stable_mosaic.version = 11 : i64} {
  func.func @_dice_partials_kernel(%arg0: i32, %arg1: memref<2x4x2x128xf32, #tpu.memory_space<vmem>>, %arg2: memref<2x1x2x128xf32, #tpu.memory_space<vmem>>, %arg3: memref<1x8x128xf32, #tpu.memory_space<vmem>>) attributes {dimension_semantics = [#tpu.dimension_semantics<parallel>], iteration_bounds = array<i64: 1>, scalar_prefetch = 0 : i64, scratch_operands = 0 : i64, tpu.core_type = #tpu.core_type<tc>, window_params = [{transform_indices = @transform_0, window_bounds = array<i64: 2, 4, 2, 128>}, {transform_indices = @transform_1, window_bounds = array<i64: 2, 1, 2, 128>}, {transform_indices = @transform_2, window_bounds = array<i64: 1, 8, 128>}]} {
    %c0 = arith.constant 0 : index
    %c1 = arith.constant 1 : index
    %c0_0 = arith.constant 0 : index
    %c0_1 = arith.constant 0 : index
    %0 = vector.load %arg1[%c0, %c1, %c0_0, %c0_1] : memref<2x4x2x128xf32, #tpu.memory_space<vmem>>, vector<2x1x2x128xf32>
    %1 = vector.shape_cast %0 : vector<2x1x2x128xf32> to vector<2x2x128xf32>
    %c0_2 = arith.constant 0 : index
    %c0_3 = arith.constant 0 : index
    %c0_4 = arith.constant 0 : index
    %c0_5 = arith.constant 0 : index
    %2 = vector.load %arg1[%c0_2, %c0_3, %c0_4, %c0_5] : memref<2x4x2x128xf32, #tpu.memory_space<vmem>>, vector<2x1x2x128xf32>
    %3 = vector.shape_cast %2 : vector<2x1x2x128xf32> to vector<2x2x128xf32>
    %4 = arith.maximumf %1, %3 : vector<2x2x128xf32>
    %c0_6 = arith.constant 0 : index
    %c2 = arith.constant 2 : index
    %c0_7 = arith.constant 0 : index
    %c0_8 = arith.constant 0 : index
    %5 = vector.load %arg1[%c0_6, %c2, %c0_7, %c0_8] : memref<2x4x2x128xf32, #tpu.memory_space<vmem>>, vector<2x1x2x128xf32>
    %6 = vector.shape_cast %5 : vector<2x1x2x128xf32> to vector<2x2x128xf32>
    %7 = arith.maximumf %4, %6 : vector<2x2x128xf32>
    %c0_9 = arith.constant 0 : index
    %c3 = arith.constant 3 : index
    %c0_10 = arith.constant 0 : index
    %c0_11 = arith.constant 0 : index
    %8 = vector.load %arg1[%c0_9, %c3, %c0_10, %c0_11] : memref<2x4x2x128xf32, #tpu.memory_space<vmem>>, vector<2x1x2x128xf32>
    %9 = vector.shape_cast %8 : vector<2x1x2x128xf32> to vector<2x2x128xf32>
    %10 = arith.maximumf %7, %9 : vector<2x2x128xf32>
    %11 = arith.subf %1, %10 : vector<2x2x128xf32>
    %12 = math.exp %11 : vector<2x2x128xf32>
    %c0_12 = arith.constant 0 : index
    %c0_13 = arith.constant 0 : index
    %c0_14 = arith.constant 0 : index
    %c0_15 = arith.constant 0 : index
    %13 = vector.load %arg1[%c0_12, %c0_13, %c0_14, %c0_15] : memref<2x4x2x128xf32, #tpu.memory_space<vmem>>, vector<2x1x2x128xf32>
    %14 = vector.shape_cast %13 : vector<2x1x2x128xf32> to vector<2x2x128xf32>
    %15 = arith.subf %14, %10 : vector<2x2x128xf32>
    %16 = math.exp %15 : vector<2x2x128xf32>
    %17 = arith.addf %12, %16 : vector<2x2x128xf32>
    %c0_16 = arith.constant 0 : index
    %c2_17 = arith.constant 2 : index
    %c0_18 = arith.constant 0 : index
    %c0_19 = arith.constant 0 : index
    %18 = vector.load %arg1[%c0_16, %c2_17, %c0_18, %c0_19] : memref<2x4x2x128xf32, #tpu.memory_space<vmem>>, vector<2x1x2x128xf32>
    %19 = vector.shape_cast %18 : vector<2x1x2x128xf32> to vector<2x2x128xf32>
    %20 = arith.subf %19, %10 : vector<2x2x128xf32>
    %21 = math.exp %20 : vector<2x2x128xf32>
    %22 = arith.addf %17, %21 : vector<2x2x128xf32>
    %c0_20 = arith.constant 0 : index
    %c3_21 = arith.constant 3 : index
    %c0_22 = arith.constant 0 : index
    %c0_23 = arith.constant 0 : index
    %23 = vector.load %arg1[%c0_20, %c3_21, %c0_22, %c0_23] : memref<2x4x2x128xf32, #tpu.memory_space<vmem>>, vector<2x1x2x128xf32>
    %24 = vector.shape_cast %23 : vector<2x1x2x128xf32> to vector<2x2x128xf32>
    %25 = arith.subf %24, %10 : vector<2x2x128xf32>
    %26 = math.exp %25 : vector<2x2x128xf32>
    %27 = arith.addf %22, %26 : vector<2x2x128xf32>
    %28 = tpu.reciprocal %27 : vector<2x2x128xf32> -> vector<2x2x128xf32>
    %29 = arith.mulf %12, %28 : vector<2x2x128xf32>
    %c0_24 = arith.constant 0 : index
    %c0_25 = arith.constant 0 : index
    %c0_26 = arith.constant 0 : index
    %c0_27 = arith.constant 0 : index
    %30 = vector.load %arg2[%c0_24, %c0_25, %c0_26, %c0_27] : memref<2x1x2x128xf32, #tpu.memory_space<vmem>>, vector<2x1x2x128xf32>
    %31 = vector.shape_cast %30 : vector<2x1x2x128xf32> to vector<2x2x128xf32>
    %32 = arith.mulf %29, %31 : vector<2x2x128xf32>
    %33 = vector.shape_cast %32 : vector<2x2x128xf32> to vector<1x2x2x128xf32>
    %cst = arith.constant dense<0.000000e+00> : vector<1xf32>
    %34 = vector.multi_reduction <add>, %33, %cst [1, 2, 3] : vector<1x2x2x128xf32> to vector<1xf32>
    %35 = vector.shape_cast %34 : vector<1xf32> to vector<1x1x1x1xf32>
    %36 = vector.extract %35[0, 0, 0, 0] : f32 from vector<1x1x1x1xf32>
    %37 = vector.shape_cast %29 : vector<2x2x128xf32> to vector<1x2x2x128xf32>
    %cst_28 = arith.constant dense<0.000000e+00> : vector<1xf32>
    %38 = vector.multi_reduction <add>, %37, %cst_28 [1, 2, 3] : vector<1x2x2x128xf32> to vector<1xf32>
    %39 = vector.shape_cast %38 : vector<1xf32> to vector<1x1x1x1xf32>
    %40 = vector.extract %39[0, 0, 0, 0] : f32 from vector<1x1x1x1xf32>
    %41 = vector.shape_cast %31 : vector<2x2x128xf32> to vector<1x2x2x128xf32>
    %cst_29 = arith.constant dense<0.000000e+00> : vector<1xf32>
    %42 = vector.multi_reduction <add>, %41, %cst_29 [1, 2, 3] : vector<1x2x2x128xf32> to vector<1xf32>
    %43 = vector.shape_cast %42 : vector<1xf32> to vector<1x1x1x1xf32>
    %44 = vector.extract %43[0, 0, 0, 0] : f32 from vector<1x1x1x1xf32>
    %45 = tpu.iota {dimensions = array<i32: 1>} : vector<1x8x128xi32>
    %c0_i32 = arith.constant 0 : i32
    %46 = vector.broadcast %c0_i32 : i32 to vector<1x8x128xi32>
    %47 = arith.cmpi eq, %45, %46 : vector<1x8x128xi32>
    %c1_i32 = arith.constant 1 : i32
    %48 = vector.broadcast %c1_i32 : i32 to vector<1x8x128xi32>
    %49 = arith.cmpi eq, %45, %48 : vector<1x8x128xi32>
    %c2_i32 = arith.constant 2 : i32
    %50 = vector.broadcast %c2_i32 : i32 to vector<1x8x128xi32>
    %51 = arith.cmpi eq, %45, %50 : vector<1x8x128xi32>
    %cst_30 = arith.constant 0.000000e+00 : f32
    %52 = vector.broadcast %44 : f32 to vector<1x8x128xf32>
    %53 = vector.broadcast %cst_30 : f32 to vector<1x8x128xf32>
    %54 = arith.select %51, %52, %53 : vector<1x8x128xi1>, vector<1x8x128xf32>
    %55 = vector.broadcast %40 : f32 to vector<1x8x128xf32>
    %56 = arith.select %49, %55, %54 : vector<1x8x128xi1>, vector<1x8x128xf32>
    %57 = vector.broadcast %36 : f32 to vector<1x8x128xf32>
    %58 = arith.select %47, %57, %56 : vector<1x8x128xi1>, vector<1x8x128xf32>
    %c0_31 = arith.constant 0 : index
    %c0_32 = arith.constant 0 : index
    %c0_33 = arith.constant 0 : index
    %59 = vector.load %arg3[%c0_31, %c0_32, %c0_33] : memref<1x8x128xf32, #tpu.memory_space<vmem>>, vector<1x8x128xf32>
    tpu.vector_store %arg3[%c0_31, %c0_32, %c0_33], %58 {strides = array<i32>} : memref<1x8x128xf32, #tpu.memory_space<vmem>>, vector<1x8x128xf32>,
    return
  }
  func.func @transform_0(%arg0: i32) -> (i32, i32, i32, i32) {
    %c0_i32 = arith.constant 0 : i32
    %c0_i32_0 = arith.constant 0 : i32
    %c0_i32_1 = arith.constant 0 : i32
    %c0_i32_2 = arith.constant 0 : i32
    return %c0_i32, %c0_i32_0, %arg0, %c0_i32_1 : i32, i32, i32, i32
  }
  func.func @transform_1(%arg0: i32) -> (i32, i32, i32, i32) {
    %c0_i32 = arith.constant 0 : i32
    %c1_i32 = arith.constant 1 : i32
    %c0_i32_0 = arith.constant 0 : i32
    %c0_i32_1 = arith.constant 0 : i32
    return %c0_i32, %c1_i32, %arg0, %c0_i32_0 : i32, i32, i32, i32
  }
  func.func @transform_2(%arg0: i32) -> (i32, i32, i32) {
    %c0_i32 = arith.constant 0 : i32
    %c0_i32_0 = arith.constant 0 : i32
    %c0_i32_1 = arith.constant 0 : i32
    return %arg0, %c0_i32, %c0_i32_0 : i32, i32, i32
  }
}

</mosaic_0001>

<bundles_post_ra>
// kernel: tpu_custom_call.1
= control target key start
LH: loop header
LB: loop body
LE: loop exit
PB: predicated region body
PF: predicated region fallthrough
CT: control target
= control target key end

     0   :  { %7 = vsyncpa [#allocation3], 0  ;;  %s339_s0 = inlined_call_operand.hbm [shape: f32[2,4,2,128], index: 0, kind: input, shape index: {}]   ;;  %s340_s1 = inlined_call_operand.hbm [shape: f32[2,4,2,128], index: 1, kind: input, shape index: {}]   ;;  %s341_s2 = inlined_call_operand.hbm [shape: f32[1,8,128], index: 2, kind: output, shape index: {}]  }
   0x1   :  { %8 = vsyncpa [#allocation6], 0 }
   0x2   :  { %9 = vsyncpa [#allocation4], 0  ;;  %s14_s11 = sshll.u32 %s339_s0, 4  ;;  %s303_s12 = smov [#allocation2]   ;;  %s15_s11 = int_to_ptr.hbm [resolvable:$true] %s14_s11 }
   0x3   :  { %s16_s13 = sshll.u32 %s303_s12, 4  ;;  %s27_s16 = scalar_lea.hbm %s340_s1, 2  ;;  %s17_s13 = int_to_ptr.vmem [resolvable:$true] %s16_s13 }
   0x4   :  { %s304_s17 = smov 32   ;;  %s305_s18 = smov 2  }
   0x5   :  { %22 = dma.hbm_to_vmem [thread:$0]  %s15_s11, 256, %s17_s13, [#allocation3], %s304_s17, %s304_s17, %s305_s18  }
   0x6   :  { %s28_s19 = sshll.u32 %s27_s16, 4  ;;  %s306_s20 = smov [#allocation5]   ;;  %s29_s19 = int_to_ptr.hbm [resolvable:$true] %s28_s19 }
   0x7   :  { %s30_s21 = sshll.u32 %s306_s20, 4  ;;  %s307_s22 = smov 128   ;;  %s31_s21 = int_to_ptr.vmem [resolvable:$true] %s30_s21 }
   0x8   :  { %36 = dma.hbm_to_vmem [thread:$0]  %s29_s19, 64, %s31_s21, [#allocation6], %s307_s22, %s304_s17, %s305_s18  }
   0x9   :  { %297 = dma.done.wait [#allocation3], 256  }
   0xa   :  { %298 = vsyncadd [#allocation3], 4294967040 }
   0xb   :  { %299 = dma.done.wait [#allocation6], 64  }
   0xc   :  { %300 = vsyncadd [#allocation6], 4294967232  ;;  %v46_v0 = vld [vmem:[#allocation2 + $0x2] sm:$0x3]  ;;  %v47_v1 = vld [vmem:[#allocation2 + $0xa] sm:$0x3] }
   0xd   :  { %v48_v2 = vld [vmem:[#allocation2] sm:$0x3]  ;;  %v49_v3 = vld [vmem:[#allocation2 + $0x8] sm:$0x3]  ;;  %v53_v5 = vld [vmem:[#allocation2 + $0x4] sm:$0x3] }
   0xe   :  { %v50_v4 = vmax.f32 %v46_v0, %v48_v2  ;;  %v54_v6 = vld [vmem:[#allocation2 + $0xc] sm:$0x3]  ;;  %v51_v7 = vmax.f32 %v47_v1, %v49_v3  ;;  %v58_v8 = vld [vmem:[#allocation2 + $0x6] sm:$0x3]  ;;  %v59_v10 = vld [vmem:[#allocation2 + $0xe] sm:$0x3] }
   0xf   :  { %v122_v31 = vld [vmem:[#allocation5] sm:$0x3]  ;;  %v123_v32 = vld [vmem:[#allocation5 + $0x2] sm:$0x3]  ;;  %vm126_vm0 = vcmask 1041408   ;;  %s308_s23 = smov [#allocation7]  }
  0x10   :  { %v55_v9 = vmax.f32 %v50_v4, %v53_v5  ;;  %v56_v11 = vmax.f32 %v51_v7, %v54_v6  ;;  %v151_v34 = vsel %vm126_vm0, %v122_v31, 0.0  ;;  %v152_v35 = vsel %vm126_vm0, %v123_v32, 0.0  ;;  %s180_s24 = sshll.u32 %s308_s23, 4  ;;  %s182_s28 = sshll.u32 %s341_s2, 4  ;;  %s181_s24 = int_to_ptr.vmem [resolvable:$true] %s180_s24  ;;  %s183_s28 = int_to_ptr.hbm [resolvable:$true] %s182_s28 }
  0x11   :  { %v153_v37 = vadd.f32 %v152_v35, %v151_v34 }
  0x12   :  { %v60_v12 = vmax.f32 %v55_v9, %v58_v8  ;;  %v61_v13 = vmax.f32 %v56_v11, %v59_v10 }
  0x13   :  { %154 = vadd.xlane.f32.xlu1 %v153_v37 }
  0x14   :  { %v62_v14 = vsub.f32 %v46_v0, %v60_v12  ;;  %v68_v15 = vsub.f32 %v48_v2, %v60_v12  ;;  %v76_v16 = vsub.f32 %v53_v5, %v60_v12  ;;  %v63_v17 = vsub.f32 %v47_v1, %v61_v13 }
  0x15   :  { %v69_v18 = vsub.f32 %v49_v3, %v61_v13  ;;  %v77_v19 = vsub.f32 %v54_v6, %v61_v13  ;;  %v84_v22 = vsub.f32 %v58_v8, %v60_v12  ;;  %v85_v25 = vsub.f32 %v59_v10, %v61_v13 }
  0x16   :  { %v64_v20 = vmul.f32 1.442695, %v62_v14  ;;  %v70_v21 = vmul.f32 1.442695, %v68_v15  ;;  %v66_v23 = vmul.f32 1.442695, %v63_v17 }
  0x17   :  { %v72_v24 = vmul.f32 1.442695, %v69_v18  ;;  %v78_v26 = vmul.f32 1.442695, %v76_v16  ;;  %v80_v27 = vmul.f32 1.442695, %v77_v19 }
  0x18   :  { %205 = vpow2.f32 %v64_v20  ;;  %v86_v28 = vmul.f32 1.442695, %v84_v22  ;;  %v88_v29 = vmul.f32 1.442695, %v85_v25 }
  0x19   :  { %207 = vpow2.f32 %v66_v23 }
  0x1a   :  { %209 = vpow2.f32 %v70_v21 }
  0x1b   :  { %211 = vpow2.f32 %v72_v24 }
  0x1c   :  { %213 = vpow2.f32 %v78_v26 }
  0x1d   :  { %215 = vpow2.f32 %v80_v27 }
  0x1e   :  { %v206_v30 = vpop.eup %205  ;;  %217 = vpow2.f32 %v86_v28 }
  0x1f   :  { %v208_v33 = vpop.eup %207  ;;  %219 = vpow2.f32 %v88_v29 }
  0x20   :  { %v210_v36 = vpop.eup %209 }
  0x21   :  { %v212_v38 = vpop.eup %211  ;;  %v74_v39 = vadd.f32 %v210_v36, %v206_v30  ;;  %v163_v36 = vlaneseq }
  0x22   :  { %v214_v40 = vpop.eup %213  ;;  %v75_v41 = vadd.f32 %v212_v38, %v208_v33 }
  0x23   :  { %v216_v42 = vpop.eup %215  ;;  %v82_v43 = vadd.f32 %v214_v40, %v74_v39  ;;  %v164_v37 = vshrl.u32 %v163_v36, 7 }
  0x24   :  { %v218_v44 = vpop.eup %217  ;;  %v83_v45 = vadd.f32 %v216_v42, %v75_v41 }
  0x25   :  { %v220_v46 = vpop.eup %219  ;;  %v90_v47 = vadd.f32 %v218_v44, %v82_v43  ;;  %vm167_vm9 = vcmp.eq.s32.totalorder %v164_v37, 2  ;;  %vm166_vm10 = vcmp.eq.s32.totalorder %v164_v37, 1  ;;  %vm165_vm11 = vcmp.eq.s32.totalorder %v164_v37, 0 }
  0x26   :  { %v91_v48 = vadd.f32 %v220_v46, %v83_v45 }
  0x27   :  { %221 = vrcp.f32 %v90_v47  ;;  %vm97_vm1 = vweird.f32 %v90_v47  ;;  %v103_v52 = vand.u32 2147483648, %v90_v47  ;;  %v101_v55 = vand.u32 2147483647, %v90_v47 }
  0x28   :  { %223 = vrcp.f32 %v91_v48  ;;  %v117_v56 = vand.u32 2147483648, %v91_v48  ;;  %vm111_vm3 = vweird.f32 %v91_v48  ;;  %v115_v58 = vand.u32 2147483647, %v91_v48 }
  0x29   :  { %v104_v60 = vor.u32 1.1754944e-38, %v103_v52  ;;  %vm102_vm6 = vcmp.eq.f32.partialorder %v101_v55, 8.507059e+37 }
  0x2a   :  { %v118_v63 = vor.u32 1.1754944e-38, %v117_v56  ;;  %vm116_vm8 = vcmp.eq.f32.partialorder %v115_v58, 8.507059e+37 }
  0x2d   :  { %v222_v49 = vpop.eup %221 }
  0x2e   :  { %v224_v50 = vpop.eup %223  ;;  %v93_v51 = vmul.f32 %v222_v49, %v90_v47  ;;  %vm98_vm2 = vweird.f32 %v222_v49 }
  0x2f   :  { %v107_v53 = vmul.f32 %v224_v50, %v91_v48  ;;  %vm112_vm4 = vweird.f32 %v224_v50  ;;  %vm99_vm5 = vmor %vm97_vm1, %vm98_vm2 }
  0x30   :  { %v94_v54 = vsub.f32 1.0, %v93_v51  ;;  %vm113_vm7 = vmor %vm111_vm3, %vm112_vm4 }
  0x31   :  { %v108_v57 = vsub.f32 1.0, %v107_v53 }
  0x32   :  { %v95_v59 = vmul.f32 %v222_v49, %v94_v54 }
  0x33   :  { %v109_v61 = vmul.f32 %v224_v50, %v108_v57 }
  0x34   :  { %v96_v62 = vadd.f32 %v222_v49, %v95_v59 }
  0x35   :  { %v110_v0 = vadd.f32 %v224_v50, %v109_v61 }
  0x36   :  { %v100_v1 = vsel %vm99_vm5, %v222_v49, %v96_v62 }
  0x37   :  { %v105_v2 = vsel %vm102_vm6, %v104_v60, %v100_v1  ;;  %v114_v3 = vsel %vm113_vm7, %v224_v50, %v110_v0 }
  0x38   :  { %v119_v4 = vsel %vm116_vm8, %v118_v63, %v114_v3  ;;  %v120_v5 = vmul.f32 %v206_v30, %v105_v2 }
  0x39   :  { %v121_v6 = vmul.f32 %v208_v33, %v119_v4 }
  0x3a   :  { %v124_v7 = vmul.f32 %v122_v31, %v120_v5  ;;  %v139_v12 = vsel %vm126_vm0, %v120_v5, 0.0 }
  0x3b   :  { %v125_v8 = vmul.f32 %v123_v32, %v121_v6  ;;  %v140_v13 = vsel %vm126_vm0, %v121_v6, 0.0 }
  0x3c   :  { %v127_v9 = vsel %vm126_vm0, %v124_v7, 0.0  ;;  %v141_v14 = vadd.f32 %v140_v13, %v139_v12 }
  0x3d   :  { %v128_v10 = vsel %vm126_vm0, %v125_v8, 0.0 }
  0x3e   :  { %v129_v11 = vadd.f32 %v128_v10, %v127_v9 }
  0x40   :  { %130 = vadd.xlane.f32.xlu0 %v129_v11 }
  0x48   :  { %142 = vadd.xlane.f32.xlu0 %v141_v14 }
  0x86   :  { %v155_v15 = vpop.xlane.xlu1 %154 }
  0x87   :  { %v156_v17 = vrot.slane %v155_v15, 4 }
  0x89   :  { %v157_v20 = vadd.f32 %v156_v17, %v155_v15 }
  0x8b   :  { %v158_v23 = vrot.slane %v157_v20, 2 }
  0x8d   :  { %v159_v29 = vadd.f32 %v158_v23, %v157_v20 }
  0x8f   :  { %v160_v32 = vrot.slane %v159_v29, 1 }
  0x91   :  { %v161_v35 = vadd.f32 %v160_v32, %v159_v29 }
  0xb3   :  { %v131_v16 = vpop.xlane.xlu0 %130 }
  0xb4   :  { %v132_v18 = vrot.slane %v131_v16, 4 }
  0xb6   :  { %v133_v19 = vadd.f32 %v132_v18, %v131_v16 }
  0xb8   :  { %v134_v21 = vrot.slane %v133_v19, 2 }
  0xba   :  { %v135_v22 = vadd.f32 %v134_v21, %v133_v19 }
  0xbb   :  { %v143_v24 = vpop.xlane.xlu0 %142 }
  0xbc   :  { %v144_v25 = vrot.slane %v143_v24, 4  ;;  %v136_v26 = vrot.slane %v135_v22, 1 }
  0xbe   :  { %v145_v27 = vadd.f32 %v144_v25, %v143_v24  ;;  %v137_v28 = vadd.f32 %v136_v26, %v135_v22 }
  0xc0   :  { %v146_v30 = vrot.slane %v145_v27, 2  ;;  %193 = vpush %v137_v28 }
  0xc2   :  { %v147_v31 = vadd.f32 %v146_v30, %v145_v27 }
  0xc4   :  { %v148_v33 = vrot.slane %v147_v31, 1 }
  0xc6   :  { %v149_v34 = vadd.f32 %v148_v33, %v147_v31 }
  0xc8   :  { %195 = vpush %v149_v34 }
  0xc9   :  { %197 = vpush %v161_v35 }
  0xf1   :  { %s194_s0 = spop %193 }
  0xf2   :  { %v172_v41 = vstv %s194_s0 }
  0xf9   :  { %s196_s1 = spop %195 }
  0xfa   :  { %v170_v38 = vstv %s196_s1  ;;  %s198_s25 = spop %197 }
  0xfb   :  { %v168_v39 = vstv %s198_s25 }
  0xfc   :  { %v169_v40 = vsel %vm167_vm9, %v168_v39, 0.0 }
  0xfd   :  { %v171_v42 = vsel %vm166_vm10, %v170_v38, %v169_v40 }
  0xfe   :  { %v173_v43 = vsel %vm165_vm11, %v172_v41, %v171_v42 }
  0xff   :  { %174 = vst [vmem:[#allocation7] sm:$0xff] %v173_v43 }
 0x100   :  { %185 = dma.vmem_to_hbm [thread:$0]  %s181_s24, 128, %s183_s28, [#allocation4]  }
 0x101   :  { %301 = dma.done.wait [#allocation4], 128  }
 0x102   :  { %302 = vsyncadd [#allocation4], 4294967168 }
 0x103   :  { %190 = vsyncpa [#allocation3], 1 }
 0x104   :  { %191 = vsyncpa [#allocation6], 1 }
 0x105   :  { %192 = vsyncpa [#allocation4], 1 }

</bundles_post_ra>
